<compile_context>
chip_gen: v7x
topology: tpu7x:2x2x1
jax: 0.10.0
libtpu: 0.0.40
codegen_flags: <defaults>
</compile_context>

<pallas_src>
from itertools import chain

import numpy as np
import jax
import jax.numpy as jnp
from jax.experimental import pallas as pl
from jax.experimental.pallas import tpu as pltpu  # noqa: F401  (TPU backend)


# ----------------------------------------------------------------------------
# Synthetic configuration (mirrors the Interval-keyed dummy_input structure).
# ----------------------------------------------------------------------------
INTERVAL_NAMES = ["d1", "h1", "m15"]          # stand-in for `Interval` enum
SORTED_INPUT_KEYS = sorted(INTERVAL_NAMES)    # AbstractModel.sorted_input_keys
NUM_INPUTS = len(SORTED_INPUT_KEYS)

BATCH = 2
SEQ = 8
FEAT = 10
OUT_DIM = 16                                  # logical output width
N_PAD = 128                                   # lane-dense padded output width
K_PER_INTERVAL = SEQ * FEAT                   # 80
K_TOTAL = NUM_INPUTS * K_PER_INTERVAL         # 240 (multiple of 16 -> clean bf16 sublanes)
B_PAD = 16                                    # bf16 LHS sublane quantum


# ----------------------------------------------------------------------------
# Pallas kernel: fused "matmul + bias" predict hot path.
#   out[B_PAD, N_PAD] = x[B_PAD, K_TOTAL] @ W[K_TOTAL, N_PAD] + bias
# Single K=240 MXU matmul (f32 accumulation), f32 bias add, one lane-dense
# unmasked store.
# ----------------------------------------------------------------------------
def _fused_predict_kernel(x_ref, w_ref, b_ref, o_ref):
    acc = jnp.dot(x_ref[...], w_ref[...], preferred_element_type=jnp.float32)
    o_ref[...] = acc + jnp.broadcast_to(b_ref[...], o_ref.shape)


def _predict_pallas(x, w, b2d):
    bpad = x.shape[0]
    flops = 2 * bpad * K_TOTAL * N_PAD
    bytes_accessed = (
        int(x.size) * x.dtype.itemsize
        + int(w.size) * w.dtype.itemsize
        + int(b2d.size) * b2d.dtype.itemsize
        + bpad * N_PAD * 4
    )

    # Toy problem: one grid point, full-array blocks resident in VMEM.
    return pl.pallas_call(
        _fused_predict_kernel,
        out_shape=jax.ShapeDtypeStruct((bpad, N_PAD), jnp.float32),
        in_specs=[
            pl.BlockSpec(x.shape, lambda: (0, 0)),
            pl.BlockSpec(w.shape, lambda: (0, 0)),
            pl.BlockSpec(b2d.shape, lambda: (0, 0)),
        ],
        out_specs=pl.BlockSpec((bpad, N_PAD), lambda: (0, 0)),
        cost_estimate=pl.CostEstimate(
            flops=flops, transcendentals=0, bytes_accessed=bytes_accessed
        ),
    )(x, w, b2d)


@jax.jit
def _predict_jit(x0, x1, x2, w, b2d):
    """Whole predict path under one jit: reshape/cast/concat/pad/kernel/slice."""
    batch = x0.shape[0]
    # Cast to bf16 once in the wrapper (MXU-native; halves activation DMA),
    # flatten each (B, S, F) -> (B, S*F) and concatenate in sorted-key order
    # so the single weight matrix sees a contiguous K axis.
    xs = [xi.reshape(batch, -1).astype(jnp.bfloat16) for xi in (x0, x1, x2)]
    x = jnp.concatenate(xs, axis=1)                     # (B, K_TOTAL) bf16
    pad = (-batch) % B_PAD
    if pad:                                             # static under jit
        x = jnp.pad(x, ((0, pad), (0, 0)))              # fill sublanes / MXU rows
    out = _predict_pallas(x, w, b2d)                    # (B_PAD, N_PAD) f32
    return out[:batch, :OUT_DIM]                        # fused slice epilogue


# ----------------------------------------------------------------------------
# Model wrapper reproducing AbstractModel semantics
# ----------------------------------------------------------------------------
class AbstractModelPallas:
    """JAX mirror of AbstractModel with a synthetic concrete `predict`."""

    def __init__(self):
        # Deterministic parameter init (synthetic; no checkpoint load).
        kw, kb = jax.random.split(jax.random.PRNGKey(42))
        w_full = jax.random.normal(kw, (K_TOTAL, OUT_DIM), jnp.float32) * 0.02
        b_full = jax.random.normal(kb, (OUT_DIM,), jnp.float32) * 0.01

        # Lane-dense padding N: 16 -> 128 with zero columns/entries (inert).
        w_pad = jnp.zeros((K_TOTAL, N_PAD), jnp.float32).at[:, :OUT_DIM].set(w_full)
        b_pad = jnp.zeros((N_PAD,), jnp.float32).at[:OUT_DIM].set(b_full)

        # Single whole weight in bf16 (one DMA, one fused K=240 matmul).
        # Accumulation stays f32 inside the kernel.
        self.w = w_pad.astype(jnp.bfloat16)             # (240, 128) bf16
        self.b = b_pad.reshape(1, N_PAD)                 # (1, 128) f32
        self.sorted_input_keys = list(SORTED_INPUT_KEYS)

    def extract_tensors(self, example):
        # TODO(synk): abstract in the source model (NotImplementedError);
        # pass-through of the interval-keyed tensors as the synthetic stand-in.
        return {k: example[k] for k in INTERVAL_NAMES}

    def predict(self, tensors):
        x_list = [jnp.asarray(tensors[k]) for k in self.sorted_input_keys]
        return _predict_jit(*x_list, self.w, self.b)

    def forward(self, tensors, *args):
        # Exact dispatch semantics of AbstractModel.forward.
        if isinstance(tensors, (jax.Array, np.ndarray)):
            return self.predict(
                {key: tensor for key, tensor in
                 zip(self.sorted_input_keys, chain([tensors], args))}
            )
        else:
            return self.predict(tensors)

    def __call__(self, tensors, *args):
        return self.forward(tensors, *args)


# ----------------------------------------------------------------------------
# Main
# ----------------------------------------------------------------------------
if __name__ == "__main__":
    key = jax.random.PRNGKey(0)
    keys = jax.random.split(key, len(INTERVAL_NAMES))
    example = {
        name: jax.random.uniform(k, (BATCH, SEQ, FEAT), jnp.float32)
        for name, k in zip(INTERVAL_NAMES, keys)
    }

    model = AbstractModelPallas()

    # Path 1: dict input (like model(tensors_dict))
    tensors = model.extract_tensors(example)
    out_dict = model(tensors)

    # Path 2: positional tensor inputs, zipped against sorted_input_keys
    positional = [tensors[k] for k in model.sorted_input_keys]
    out_pos = model(positional[0], *positional[1:])

    out_dict = jax.block_until_ready(out_dict)
    out_pos = jax.block_until_ready(out_pos)

    # Pure-JAX reference (f32 weights reconstructed from bf16 params for a
    # tolerance check of the bf16 MXU path).
    x_ref = jnp.concatenate(
        [tensors[k].reshape(BATCH, -1) for k in model.sorted_input_keys], axis=1
    )
    ref = (x_ref.astype(jnp.bfloat16) @ model.w).astype(jnp.float32) + model.b
    ref = ref[:, :OUT_DIM]

    assert out_dict.shape == (BATCH, OUT_DIM), out_dict.shape
    assert out_pos.shape == (BATCH, OUT_DIM), out_pos.shape
    assert bool(jnp.allclose(out_dict, out_pos)), "dispatch paths disagree"
    assert bool(jnp.all(jnp.isfinite(out_dict))), "non-finite output"
    assert bool(jnp.allclose(out_dict, ref, atol=1e-2, rtol=1e-2)), "kernel != reference"

    print("KERNEL_OK")
</pallas_src>

<mosaic_0001>
module attributes {stable_mosaic.version = 11 : i64} {
  func.func @_fused_predict_kernel(%arg0: memref<16x240xbf16, #tpu.memory_space<vmem>>, %arg1: memref<240x128xbf16, #tpu.memory_space<vmem>>, %arg2: memref<1x128xf32, #tpu.memory_space<vmem>>, %arg3: memref<16x128xf32, #tpu.memory_space<vmem>>) attributes {dimension_semantics = [], scalar_prefetch = 0 : i64, scratch_operands = 0 : i64, tpu.core_type = #tpu.core_type<tc>} {
    %c0 = arith.constant 0 : index
    %c0_0 = arith.constant 0 : index
    %0 = vector.load %arg0[%c0, %c0_0] : memref<16x240xbf16, #tpu.memory_space<vmem>>, vector<16x240xbf16>
    %c0_1 = arith.constant 0 : index
    %c0_2 = arith.constant 0 : index
    %1 = vector.load %arg1[%c0_1, %c0_2] : memref<240x128xbf16, #tpu.memory_space<vmem>>, vector<240x128xbf16>
    %cst = arith.constant dense<0.000000e+00> : vector<16x128xf32>
    %2 = tpu.matmul %0, %1, %cst {dimension_numbers = #tpu.dot_dimension_numbers<[1], [0], [0], [1], [0, 0, 1, 1], [], []>} : vector<16x240xbf16>, vector<240x128xbf16>, vector<16x128xf32> -> vector<16x128xf32>
    %c0_3 = arith.constant 0 : index
    %c0_4 = arith.constant 0 : index
    %3 = vector.load %arg2[%c0_3, %c0_4] : memref<1x128xf32, #tpu.memory_space<vmem>>, vector<1x128xf32>
    %4 = vector.shape_cast %3 : vector<1x128xf32> to vector<1x128xf32>
    %5 = vector.broadcast %4 : vector<1x128xf32> to vector<16x128xf32>
    %6 = arith.addf %2, %5 : vector<16x128xf32>
    %c0_5 = arith.constant 0 : index
    %c0_6 = arith.constant 0 : index
    %7 = vector.load %arg3[%c0_5, %c0_6] : memref<16x128xf32, #tpu.memory_space<vmem>>, vector<16x128xf32>
    tpu.vector_store %arg3[%c0_5, %c0_6], %6 {strides = array<i32>} : memref<16x128xf32, #tpu.memory_space<vmem>>, vector<16x128xf32>,
    return
  }
}

</mosaic_0001>

<bundles_post_ra>
// kernel: _predict_jit.1
= control target key start
LH: loop header
LB: loop body
LE: loop exit
PB: predicated region body
PF: predicated region fallthrough
CT: control target
= control target key end

     0   :  { %v242_v0 = vmov 0   ;;  %vm153_vm0 = vcmask 916480   ;;  %s323_s1 = inlined_call_operand.vmem [shape: bf16[240,128], index: 1, kind: input, shape index: {}]   ;;  %s324_s0 = inlined_call_operand.vmem [shape: bf16[16,240], index: 0, kind: input, shape index: {}]   ;;  %s325_s2 = inlined_call_operand.vmem [shape: f32[1,128], index: 2, kind: input, shape index: {}]   ;;  %s326_s3 = inlined_call_operand.vmem [shape: f32[16,128], index: 3, kind: output, shape index: {}]  }
   0x1   :  { %157 = vmatprep.subr.bf16.mxu0 %v242_v0  ;;  %v224_v1 = vld [vmem:[%s323_s1] sm:$0xff]   ;;  %v225_v2 = vld [vmem:[%s323_s1 + $0x8] sm:$0xff]   ;;  %v226_v3 = vld [vmem:[%s323_s1 + $0x10] sm:$0xff]  }
   0x2   :  { %158 = vmatpush1.bf16.msra.mxu0 %v224_v1  ;;  %v227_v4 = vld [vmem:[%s323_s1 + $0x18] sm:$0xff]   ;;  %v228_v5 = vld [vmem:[%s323_s1 + $0x20] sm:$0xff]   ;;  %v229_v7 = vld [vmem:[%s323_s1 + $0x28] sm:$0xff]  }
   0x3   :  { %159 = vmatprep.subr.bf16.mxu0 %v242_v0  ;;  %v241_v6 = vld [vmem:[%s324_s0 + $0x4] ss:$8 sps:$4 sm:$0xff]   ;;  %v230_v8 = vld [vmem:[%s323_s1 + $0x30] sm:$0xff]   ;;  %v231_v9 = vld [vmem:[%s323_s1 + $0x38] sm:$0xff]  }
   0x4   :  { %222 = vmatprep.mubr.msk.bf16.mxu0 %vm153_vm0, %v241_v6  ;;  %v232_v10 = vld [vmem:[%s323_s1 + $0x40] sm:$0xff]   ;;  %v233_v11 = vld [vmem:[%s323_s1 + $0x48] sm:$0xff]   ;;  %v234_v12 = vld [vmem:[%s323_s1 + $0x50] sm:$0xff]  }
   0x5   :  { %v235_v13 = vld [vmem:[%s323_s1 + $0x58] sm:$0xff]   ;;  %v236_v14 = vld [vmem:[%s323_s1 + $0x60] sm:$0xff]   ;;  %v237_v15 = vld [vmem:[%s323_s1 + $0x68] sm:$0xff]  }
   0x6   :  { %160 = vmatpush1.bf16.msra.mxu0 %v225_v2  ;;  %v238_v16 = vld [vmem:[%s323_s1 + $0x70] sm:$0xff]   ;;  %v239_v17 = vld [vmem:[%s324_s0] ss:$8 sps:$4 sm:$0xff]  }
   0x7   :  { %161 = vmatprep.subr.bf16.mxu0 %v242_v0  ;;  %v204_v18 = vld [vmem:[%s325_s2] ss:$0 sm:$0xff] }
   0xa   :  { %162 = vmatpush1.bf16.msra.mxu0 %v226_v3 }
   0xb   :  { %163 = vmatprep.subr.bf16.mxu0 %v242_v0 }
   0xe   :  { %164 = vmatpush1.bf16.msra.mxu0 %v227_v4 }
   0xf   :  { %165 = vmatprep.subr.bf16.mxu0 %v242_v0 }
  0x12   :  { %166 = vmatpush1.bf16.msra.mxu0 %v228_v5 }
  0x13   :  { %167 = vmatprep.subr.bf16.mxu0 %v242_v0 }
  0x16   :  { %168 = vmatpush1.bf16.msra.mxu0 %v229_v7 }
  0x17   :  { %169 = vmatprep.subr.bf16.mxu0 %v242_v0 }
  0x1a   :  { %170 = vmatpush1.bf16.msra.mxu0 %v230_v8 }
  0x1b   :  { %171 = vmatprep.subr.bf16.mxu0 %v242_v0 }
  0x1e   :  { %172 = vmatpush1.bf16.msra.mxu0 %v231_v9 }
  0x1f   :  { %173 = vmatprep.subr.bf16.mxu0 %v242_v0 }
  0x22   :  { %174 = vmatpush1.bf16.msra.mxu0 %v232_v10 }
  0x23   :  { %175 = vmatprep.subr.bf16.mxu0 %v242_v0 }
  0x26   :  { %176 = vmatpush1.bf16.msra.mxu0 %v233_v11 }
  0x27   :  { %177 = vmatprep.subr.bf16.mxu0 %v242_v0 }
  0x2a   :  { %178 = vmatpush1.bf16.msra.mxu0 %v234_v12 }
  0x2b   :  { %179 = vmatprep.subr.bf16.mxu0 %v242_v0 }
  0x2e   :  { %180 = vmatpush1.bf16.msra.mxu0 %v235_v13 }
  0x2f   :  { %181 = vmatprep.subr.bf16.mxu0 %v242_v0 }
  0x32   :  { %182 = vmatpush1.bf16.msra.mxu0 %v236_v14 }
  0x33   :  { %183 = vmatprep.subr.bf16.mxu0 %v242_v0 }
  0x36   :  { %184 = vmatpush1.bf16.msra.mxu0 %v237_v15 }
  0x37   :  { %185 = vmatprep.subr.bf16.mxu0 %v242_v0 }
  0x3a   :  { %186 = vmatpush1.bf16.msra.mxu0 %v238_v16 }
  0x3d   :  { %190 = vmatmul.mubr.bf16.vlgmr.msra.gmra.mrb[0].mxu0 %v239_v17 }
 0x110   :  { %v191_v19 = vpop.f32.mrb[0].mxu0 }
 0x111   :  { %v192_v20 = vadd.f32 %v204_v18, %v191_v19  ;;  %v193_v21 = vpop.f32.mrb[1].mxu0 }
 0x112   :  { %v194_v22 = vpop.f32.mrb[2].mxu0 }
 0x113   :  { %198 = vst [vmem:[%s326_s3] sm:$0xff] %v192_v20  ;;  %v195_v23 = vadd.f32 %v204_v18, %v194_v22  ;;  %v196_v24 = vpop.f32.mrb[3].mxu0 }
 0x115   :  { %199 = vst [vmem:[%s326_s3 + $0x8] sm:$0xff] %v195_v23 }

</bundles_post_ra>
